<compile_context>
chip_gen: v6e
topology: v6e:2x2x1
jax: 0.10.0
libtpu: 0.0.40
codegen_flags: <defaults>
</compile_context>

<pallas_src>
import functools
import math

import numpy as np
import jax
import jax.numpy as jnp
from jax.experimental import pallas as pl
from jax.experimental.pallas import tpu as pltpu

PAD = 128
LANE_REWARD = 6      # reward column inside the packed feature slab (== state_dim)
LANE_ACTION = 8      # action occupies lanes [8, 8+action_dim)
VMEM = pl.BlockSpec(memory_space=pltpu.MemorySpace.VMEM)


def _init_linear(key, fan_in, fan_out):
    """Deterministic PyTorch-style Linear init: U(-1/sqrt(fan_in), 1/sqrt(fan_in))."""
    kw, kb = jax.random.split(key)
    bound = 1.0 / math.sqrt(fan_in)
    w = jax.random.uniform(kw, (fan_in, fan_out), jnp.float32, -bound, bound)
    b = jax.random.uniform(kb, (fan_out,), jnp.float32, -bound, bound)
    return w, b


def _plane(mat, row0=0, col0=0):
    """Embed a small matrix into a zero (128,128) f32 plane at (row0, col0)."""
    p = np.zeros((PAD, PAD), np.float32)
    m = np.asarray(mat, np.float32)
    p[row0:row0 + m.shape[0], col0:col0 + m.shape[1]] = m
    return p


# ------------------------------ fused Pallas kernel ------------------------------

def _mepg_fused_kernel(feat_ref, w_ref, b_ref, out_ref, *,
                       T, S, action_dim, lane_tval, alpha, discount, log_const):
    f32 = jnp.float32
    bf16 = jnp.bfloat16
    n = T * S

    feat = feat_ref[...]                                            # (n, 128) f32

    # ---- policy log-likelihood (MXU bf16 matmuls, f32 accumulate / VPU math) ----
    # feat lanes: 0..5 state, 6 reward, 8..8+A-1 action, lane_tval time feature.
    # Non-state lanes hit all-zero weight rows, so they never contaminate the MLPs.
    h = jnp.maximum(
        jnp.dot(feat.astype(bf16), w_ref[0], preferred_element_type=f32)
        + b_ref[0:1, :], 0.0)
    mu = jnp.dot(h.astype(bf16), w_ref[1], preferred_element_type=f32) + b_ref[1:2, :]
    diff = feat - mu                      # action - mu lives at lanes 8..8+A-1
    # Quadratic form via one MXU dot against the padded Sigma^-1 plane (plane 2):
    # dw is exactly zero outside the action lanes, so the full lane-sum is safe.
    dw = jnp.dot(diff.astype(bf16), w_ref[2], preferred_element_type=f32)
    quad = jnp.sum(diff * dw, axis=1, keepdims=True)
    ll_col = log_const - 0.5 * quad                                  # (n, 1)

    # ---- pull reward / time-feature columns out of the packed slab --------------
    lane = jax.lax.broadcasted_iota(jnp.int32, (n, PAD), 1)
    r_col = jnp.sum(jnp.where(lane == LANE_REWARD, feat, 0.0), axis=1, keepdims=True)
    tval_col = jnp.sum(jnp.where(lane == lane_tval, feat, 0.0), axis=1, keepdims=True)

    # ---- baseline MLP (forward only) on shifted feat slices, no scratch ---------
    # Row-block b of x: state at time b+1 for b <= T-3; zeros for b == T-2 (never
    # written in the original); state at time T-1 for b == T-1.  Non-state lanes of
    # the shifted slices hit zero rows of the baseline weight plane (plane 3); the
    # lane-6 time feature is folded in as an outer product with b_ref row 5 (which
    # holds the bf16-rounded time-weight row of the baseline's first layer).
    x_state = jnp.concatenate(
        [feat[S:(T - 1) * S, :], jnp.zeros((S, PAD), f32), feat[(T - 1) * S:, :]],
        axis=0)
    z1 = (jnp.dot(x_state.astype(bf16), w_ref[3], preferred_element_type=f32)
          + tval_col * b_ref[5:6, :] + b_ref[2:3, :])
    h1 = jnp.maximum(z1, 0.0)
    h2 = jnp.maximum(
        jnp.dot(h1.astype(bf16), w_ref[4], preferred_element_type=f32) + b_ref[3:4, :],
        0.0)
    bout = jnp.dot(h2.astype(bf16), w_ref[5], preferred_element_type=f32) + b_ref[4:5, :]
    b_col = jnp.sum(bout, axis=1, keepdims=True)    # lanes >= 1 are exactly zero

    # ---- reverse rollout recurrence on sublane-aligned (S,1) blocks -------------
    llb = lambda t: ll_col[t * S:(t + 1) * S, :]
    bbk = lambda t: b_col[t * S:(t + 1) * S, :]
    rwd = lambda t: r_col[t * S:(t + 1) * S, :]

    cr = [None] * T
    cr[T - 1] = rwd(T - 1) + alpha * llb(T - 1)
    for t in range(T - 2, 0, -1):
        cr[t] = rwd(t + 1) - rwd(t) + discount * cr[t + 1] + alpha * llb(t)
    cr[0] = rwd(1) - rwd(0) + alpha * llb(0)   # PyTorch quirk: no discount*cr[1] term

    # advantage is detached in the original (forward value identical)
    sum_adv = cr[0] - bbk(0)
    sum_ll = llb(0)
    for t in range(1, T):
        sum_adv = sum_adv + (cr[t] - bbk(t))
        sum_ll = sum_ll + llb(t)

    # obj = sum_s (sum_t adv[t,s]) * (sum_t ll[t,s]) / (T*S)
    tot = jnp.sum(sum_adv * sum_ll, axis=0, keepdims=True)           # (1, 1)
    out_ref[...] = jnp.zeros((8, PAD), f32) + tot * (1.0 / (T * S))


# ------------------------------ MEPG loss module ------------------------------

class MEPGLossPallas:
    def __init__(self, sd, alpha, discount, trajectory_length, simulations,
                 state_dim, action_dim, key):
        self.alpha = float(alpha)
        self.discount = float(discount)
        self.T = int(trajectory_length)
        self.S = int(simulations)
        assert self.T >= 3, "rollout quirks assume trajectory_length >= 3"
        self.state_dim = int(state_dim)
        self.action_dim = int(action_dim)
        # The original module hard-codes x[:6, ...] = state and x[6, ...] = time,
        # so state_dim must be exactly 6 for the packed-lane layout to be valid.
        assert self.state_dim == 6
        assert LANE_ACTION + self.action_dim + 1 <= PAD

        sd_np = np.asarray(sd, np.float64)
        sinv_np = np.asarray(np.linalg.inv(sd_np), np.float32)
        self.sinv = jnp.asarray(sinv_np, jnp.float32)
        _, logdet = np.linalg.slogdet(sd_np)
        self.log_const = float(-0.5 * (self.action_dim * math.log(2.0 * math.pi) + logdet))

        k = jax.random.split(key, 6)
        # The `model` argument of forward(): deterministic policy MLP 6 -> 32 -> action_dim.
        self.pw1, self.pb1 = _init_linear(k[0], self.state_dim, 32)
        self.pw2, self.pb2 = _init_linear(k[1], 32, self.action_dim)
        # BaselineModel(7, 1) with hidden 32, deterministically initialized.
        # TODO(synk): Baseline_approximation's in-forward Adam/MSE training loop (1000 epochs)
        # has no clean Pallas equivalent; only the baseline's forward MLP runs (in-kernel).
        self.bw1, self.bb1 = _init_linear(k[2], 7, 32)
        self.bw2, self.bb2 = _init_linear(k[3], 32, 32)
        self.bw3, self.bb3 = _init_linear(k[4], 32, 1)

        A = self.action_dim
        # --- ONE packed weight slab (bf16): 6 planes of (128,128) -------------------
        w_planes = np.stack([
            _plane(np.asarray(self.pw1)),                            # 0: policy L1 (6->32)
            _plane(np.asarray(self.pw2), col0=LANE_ACTION),          # 1: policy L2, mu at lanes 8..
            _plane(sinv_np, row0=LANE_ACTION, col0=LANE_ACTION),     # 2: Sigma^-1
            _plane(np.asarray(self.bw1)[:6, :]),                     # 3: baseline L1 (state rows only)
            _plane(np.asarray(self.bw2)),                            # 4: baseline L2
            _plane(np.asarray(self.bw3)),                            # 5: baseline L3
        ])
        self._w_slab = jnp.asarray(w_planes, jnp.bfloat16)           # (6,128,128)

        # --- ONE packed bias/scalar slab (f32): (8,128) ------------------------------
        biases = np.zeros((8, PAD), np.float32)
        biases[0, :32] = np.asarray(self.pb1)
        biases[1, LANE_ACTION:LANE_ACTION + A] = np.asarray(self.pb2)
        biases[2, :32] = np.asarray(self.bb1)
        biases[3, :32] = np.asarray(self.bb2)
        biases[4, :1] = np.asarray(self.bb3)
        # Row 5: baseline time-feature weight row, pre-rounded to bf16 so the in-kernel
        # f32 outer product matches the bf16 matmul path exactly.
        biases[5, :32] = np.asarray(
            jnp.asarray(self.bw1)[6, :].astype(jnp.bfloat16).astype(jnp.float32))
        self._b_slab = jnp.asarray(biases, jnp.float32)

        # --- time-feature column (compile-time constant, exact for any S) ------------
        tvals = np.zeros((self.T,), np.float32)
        tvals[:self.T - 2] = np.arange(1, self.T - 1, dtype=np.float32)
        tvals[self.T - 2] = 0.0                      # never-written block quirk
        tvals[self.T - 1] = float(self.T - 1)
        self._tval_col = jnp.asarray(np.repeat(tvals, self.S)[:, None])   # (n,1)

        self._forward = jax.jit(self._forward_impl)

    def _forward_impl(self, state, action, reward):
        T, S, A = self.T, self.S, self.action_dim
        n = T * S
        f32 = jnp.float32
        # Flatten as row = time*S + sim (matches the PyTorch [time, simulation] order).
        # These few reshapes/concat fuse into a single small XLA op under jit.
        s_flat = jnp.transpose(state, (2, 0, 1)).reshape(n, self.state_dim).astype(f32)
        a_flat = jnp.transpose(action, (2, 0, 1)).reshape(n, A).astype(f32)
        r_col = jnp.transpose(reward).astype(f32).reshape(n, 1)
        # ONE packed dynamic slab: [state(6) | reward | 0 | action(A) | time | 0...]
        feat = jnp.concatenate(
            [s_flat, r_col,
             jnp.zeros((n, LANE_ACTION - self.state_dim - 1), f32),
             a_flat, self._tval_col,
             jnp.zeros((n, PAD - LANE_ACTION - A - 1), f32)], axis=1)

        kernel = functools.partial(
            _mepg_fused_kernel, T=T, S=S, action_dim=A, lane_tval=LANE_ACTION + A,
            alpha=self.alpha, discount=self.discount, log_const=self.log_const)

        # Grid-less, everything resident in VMEM (total footprint << VMEM on all gens).
        out = pl.pallas_call(
            kernel,
            out_shape=jax.ShapeDtypeStruct((8, PAD), jnp.float32),
            in_specs=[VMEM, VMEM, VMEM],
            out_specs=VMEM,
        )(feat, self._w_slab, self._b_slab)
        return out[0, 0]

    def __call__(self, state, action, reward):
        return self._forward(state, action, reward)

    # --- faithful pure-JAX reproduction of Advantage_estimator's rollout (reference) ---
    def _rollout(self, ll, state, reward):
        T, S = self.T, self.S
        alpha, discount = self.alpha, self.discount
        cr = jnp.zeros((T, S), jnp.float32)
        x = jnp.zeros((7, T * S), jnp.float32)

        cr = cr.at[T - 1].set(reward[:, T - 1] + alpha * ll[T - 1])
        x = x.at[:6, (T - 1) * S:T * S].set(state[:, :, T - 1].T)
        x = x.at[6, (T - 1) * S:T * S].set(float(T - 1))
        for t in reversed(range(1, T - 1)):
            cr = cr.at[t].set(reward[:, t + 1] - reward[:, t]
                              + discount * cr[t + 1] + alpha * ll[t])
            x = x.at[:6, (t - 1) * S:t * S].set(state[:, :, t].T)
            x = x.at[6, (t - 1) * S:t * S].set(float(t))
        t = 1  # value of `time` after the PyTorch loop (quirk preserved)
        cr = cr.at[0].set(reward[:, 1] - reward[:, 0] + alpha * ll[0])
        x = x.at[:6, 0:S].set(state[:, :, t].T)
        x = x.at[6, 0:S].set(float(t))
        return cr, x


# ------------------------------ pure-JAX reference ------------------------------

def reference_forward(loss, state, action, reward):
    """Mirrors the module semantics with the same bf16-at-the-dot numerics."""
    f32, bf16 = jnp.float32, jnp.bfloat16
    T, S, n = loss.T, loss.S, loss.T * loss.S

    def mm(x, w):
        return jnp.dot(x.astype(bf16), w.astype(bf16), preferred_element_type=f32)

    s_flat = jnp.transpose(state, (2, 0, 1)).reshape(n, loss.state_dim).astype(f32)
    a_flat = jnp.transpose(action, (2, 0, 1)).reshape(n, loss.action_dim).astype(f32)
    h = jnp.maximum(mm(s_flat, loss.pw1) + loss.pb1, 0.0)
    mu = mm(h, loss.pw2) + loss.pb2
    diff = a_flat - mu
    dw = mm(diff, loss.sinv)
    quad = jnp.sum(diff * dw, axis=-1)
    ll = (loss.log_const - 0.5 * quad).reshape(T, S)

    cr, x = loss._rollout(ll, state, reward)
    xT = x.T
    h1 = jnp.maximum(mm(xT, loss.bw1) + loss.bb1, 0.0)
    h2 = jnp.maximum(mm(h1, loss.bw2) + loss.bb2, 0.0)
    base = (mm(h2, loss.bw3) + loss.bb3)[:, 0]
    adv = cr - base.reshape(T, S)

    exp_t = jnp.stack([jnp.sum(adv * ll[t][None, :]) / S for t in range(T)])
    return jnp.sum(exp_t) / T


# ------------------------------ main ------------------------------

if __name__ == "__main__":
    T, S = 8, 8                 # trajectory_length, simulations
    STATE_DIM, ACT_DIM = 6, 2   # state dim fixed at 6 by the module's x[:6] usage

    key = jax.random.PRNGKey(0)
    k_params, k_s, k_a, k_r = jax.random.split(key, 4)

    sd = 0.25 * np.eye(ACT_DIM, dtype=np.float32)   # MVN covariance
    loss = MEPGLossPallas(sd, alpha=0.1, discount=0.99,
                          trajectory_length=T, simulations=S,
                          state_dim=STATE_DIM, action_dim=ACT_DIM, key=k_params)

    # PyTorch layouts: state [sim, 6, T], action [sim, A, T], reward [sim, T]
    state = jax.random.normal(k_s, (S, STATE_DIM, T), jnp.float32)
    action = jax.random.normal(k_a, (S, ACT_DIM, T), jnp.float32)
    reward = jax.random.normal(k_r, (S, T), jnp.float32)

    out = jax.block_until_ready(loss(state, action, reward))
    ref = jax.block_until_ready(reference_forward(loss, state, action, reward))

    assert np.isfinite(float(out))
    np.testing.assert_allclose(float(out), float(ref), rtol=1e-2, atol=1e-2)
    print("KERNEL_OK")
</pallas_src>

<mosaic_0001>
module attributes {stable_mosaic.version = 11 : i64} {
  func.func @_mepg_fused_kernel(%arg0: memref<64x128xf32, #tpu.memory_space<vmem>>, %arg1: memref<6x128x128xbf16, #tpu.memory_space<vmem>>, %arg2: memref<8x128xf32, #tpu.memory_space<vmem>>, %arg3: memref<8x128xf32, #tpu.memory_space<vmem>>) attributes {dimension_semantics = [], scalar_prefetch = 0 : i64, scratch_operands = 0 : i64, tpu.core_type = #tpu.core_type<tc>} {
    %c0 = arith.constant 0 : index
    %c0_0 = arith.constant 0 : index
    %0 = vector.load %arg0[%c0, %c0_0] : memref<64x128xf32, #tpu.memory_space<vmem>>, vector<64x128xf32>
    %1 = arith.truncf %0 : vector<64x128xf32> to vector<64x128xbf16>
    %c0_1 = arith.constant 0 : index
    %c0_2 = arith.constant 0 : index
    %c0_3 = arith.constant 0 : index
    %2 = vector.load %arg1[%c0_1, %c0_2, %c0_3] : memref<6x128x128xbf16, #tpu.memory_space<vmem>>, vector<1x128x128xbf16>
    %3 = vector.shape_cast %2 : vector<1x128x128xbf16> to vector<128x128xbf16>
    %cst = arith.constant dense<0.000000e+00> : vector<64x128xf32>
    %4 = tpu.matmul %1, %3, %cst {dimension_numbers = #tpu.dot_dimension_numbers<[1], [0], [0], [1], [0, 0, 1, 1], [], []>} : vector<64x128xbf16>, vector<128x128xbf16>, vector<64x128xf32> -> vector<64x128xf32>
    %c0_4 = arith.constant 0 : index
    %c0_5 = arith.constant 0 : index
    %5 = vector.load %arg2[%c0_4, %c0_5] : memref<8x128xf32, #tpu.memory_space<vmem>>, vector<1x128xf32>
    %6 = vector.broadcast %5 : vector<1x128xf32> to vector<64x128xf32>
    %7 = arith.addf %4, %6 : vector<64x128xf32>
    %cst_6 = arith.constant 0.000000e+00 : f32
    %8 = vector.broadcast %cst_6 : f32 to vector<64x128xf32>
    %9 = arith.maximumf %7, %8 : vector<64x128xf32>
    %10 = arith.truncf %9 : vector<64x128xf32> to vector<64x128xbf16>
    %c1 = arith.constant 1 : index
    %c0_7 = arith.constant 0 : index
    %c0_8 = arith.constant 0 : index
    %11 = vector.load %arg1[%c1, %c0_7, %c0_8] : memref<6x128x128xbf16, #tpu.memory_space<vmem>>, vector<1x128x128xbf16>
    %12 = vector.shape_cast %11 : vector<1x128x128xbf16> to vector<128x128xbf16>
    %cst_9 = arith.constant dense<0.000000e+00> : vector<64x128xf32>
    %13 = tpu.matmul %10, %12, %cst_9 {dimension_numbers = #tpu.dot_dimension_numbers<[1], [0], [0], [1], [0, 0, 1, 1], [], []>} : vector<64x128xbf16>, vector<128x128xbf16>, vector<64x128xf32> -> vector<64x128xf32>
    %c1_10 = arith.constant 1 : index
    %c0_11 = arith.constant 0 : index
    %14 = vector.load %arg2[%c1_10, %c0_11] : memref<8x128xf32, #tpu.memory_space<vmem>>, vector<1x128xf32>
    %15 = vector.broadcast %14 : vector<1x128xf32> to vector<64x128xf32>
    %16 = arith.addf %13, %15 : vector<64x128xf32>
    %17 = arith.subf %0, %16 : vector<64x128xf32>
    %18 = arith.truncf %17 : vector<64x128xf32> to vector<64x128xbf16>
    %c2 = arith.constant 2 : index
    %c0_12 = arith.constant 0 : index
    %c0_13 = arith.constant 0 : index
    %19 = vector.load %arg1[%c2, %c0_12, %c0_13] : memref<6x128x128xbf16, #tpu.memory_space<vmem>>, vector<1x128x128xbf16>
    %20 = vector.shape_cast %19 : vector<1x128x128xbf16> to vector<128x128xbf16>
    %cst_14 = arith.constant dense<0.000000e+00> : vector<64x128xf32>
    %21 = tpu.matmul %18, %20, %cst_14 {dimension_numbers = #tpu.dot_dimension_numbers<[1], [0], [0], [1], [0, 0, 1, 1], [], []>} : vector<64x128xbf16>, vector<128x128xbf16>, vector<64x128xf32> -> vector<64x128xf32>
    %22 = arith.mulf %17, %21 : vector<64x128xf32>
    %cst_15 = arith.constant dense<0.000000e+00> : vector<64xf32>
    %23 = vector.multi_reduction <add>, %22, %cst_15 [1] : vector<64x128xf32> to vector<64xf32>
    %24 = vector.shape_cast %23 : vector<64xf32> to vector<64x1xf32>
    %cst_16 = arith.constant 5.000000e-01 : f32
    %25 = vector.broadcast %cst_16 : f32 to vector<64x1xf32>
    %26 = arith.mulf %25, %24 : vector<64x1xf32>
    %cst_17 = arith.constant -0.4515827 : f32
    %27 = vector.broadcast %cst_17 : f32 to vector<64x1xf32>
    %28 = arith.subf %27, %26 : vector<64x1xf32>
    %29 = tpu.iota {dimensions = array<i32: 1>} : vector<64x128xi32>
    %c6_i32 = arith.constant 6 : i32
    %30 = vector.broadcast %c6_i32 : i32 to vector<64x128xi32>
    %31 = arith.cmpi eq, %29, %30 : vector<64x128xi32>
    %cst_18 = arith.constant 0.000000e+00 : f32
    %32 = vector.broadcast %cst_18 : f32 to vector<64x128xf32>
    %33 = arith.select %31, %0, %32 : vector<64x128xi1>, vector<64x128xf32>
    %cst_19 = arith.constant dense<0.000000e+00> : vector<64xf32>
    %34 = vector.multi_reduction <add>, %33, %cst_19 [1] : vector<64x128xf32> to vector<64xf32>
    %35 = vector.shape_cast %34 : vector<64xf32> to vector<64x1xf32>
    %c10_i32 = arith.constant 10 : i32
    %36 = vector.broadcast %c10_i32 : i32 to vector<64x128xi32>
    %37 = arith.cmpi eq, %29, %36 : vector<64x128xi32>
    %cst_20 = arith.constant 0.000000e+00 : f32
    %38 = vector.broadcast %cst_20 : f32 to vector<64x128xf32>
    %39 = arith.select %37, %0, %38 : vector<64x128xi1>, vector<64x128xf32>
    %cst_21 = arith.constant dense<0.000000e+00> : vector<64xf32>
    %40 = vector.multi_reduction <add>, %39, %cst_21 [1] : vector<64x128xf32> to vector<64xf32>
    %41 = vector.shape_cast %40 : vector<64xf32> to vector<64x1xf32>
    %42 = vector.extract_strided_slice %0 {offsets = [8, 0], sizes = [48, 128], strides = [1, 1]} : vector<64x128xf32> to vector<48x128xf32>
    %cst_22 = arith.constant 0.000000e+00 : f32
    %43 = vector.broadcast %cst_22 : f32 to vector<8x128xf32>
    %44 = vector.extract_strided_slice %0 {offsets = [56, 0], sizes = [8, 128], strides = [1, 1]} : vector<64x128xf32> to vector<8x128xf32>
    %45 = tpu.concatenate %42, %43, %44 in 0 : vector<48x128xf32>, vector<8x128xf32>, vector<8x128xf32> -> vector<64x128xf32>
    %46 = arith.truncf %45 : vector<64x128xf32> to vector<64x128xbf16>
    %c3 = arith.constant 3 : index
    %c0_23 = arith.constant 0 : index
    %c0_24 = arith.constant 0 : index
    %47 = vector.load %arg1[%c3, %c0_23, %c0_24] : memref<6x128x128xbf16, #tpu.memory_space<vmem>>, vector<1x128x128xbf16>
    %48 = vector.shape_cast %47 : vector<1x128x128xbf16> to vector<128x128xbf16>
    %cst_25 = arith.constant dense<0.000000e+00> : vector<64x128xf32>
    %49 = tpu.matmul %46, %48, %cst_25 {dimension_numbers = #tpu.dot_dimension_numbers<[1], [0], [0], [1], [0, 0, 1, 1], [], []>} : vector<64x128xbf16>, vector<128x128xbf16>, vector<64x128xf32> -> vector<64x128xf32>
    %c5 = arith.constant 5 : index
    %c0_26 = arith.constant 0 : index
    %50 = vector.load %arg2[%c5, %c0_26] : memref<8x128xf32, #tpu.memory_space<vmem>>, vector<1x128xf32>
    %51 = vector.broadcast %41 : vector<64x1xf32> to vector<64x128xf32>
    %52 = vector.broadcast %50 : vector<1x128xf32> to vector<64x128xf32>
    %53 = arith.mulf %51, %52 : vector<64x128xf32>
    %54 = arith.addf %49, %53 : vector<64x128xf32>
    %c2_27 = arith.constant 2 : index
    %c0_28 = arith.constant 0 : index
    %55 = vector.load %arg2[%c2_27, %c0_28] : memref<8x128xf32, #tpu.memory_space<vmem>>, vector<1x128xf32>
    %56 = vector.broadcast %55 : vector<1x128xf32> to vector<64x128xf32>
    %57 = arith.addf %54, %56 : vector<64x128xf32>
    %cst_29 = arith.constant 0.000000e+00 : f32
    %58 = vector.broadcast %cst_29 : f32 to vector<64x128xf32>
    %59 = arith.maximumf %57, %58 : vector<64x128xf32>
    %60 = arith.truncf %59 : vector<64x128xf32> to vector<64x128xbf16>
    %c4 = arith.constant 4 : index
    %c0_30 = arith.constant 0 : index
    %c0_31 = arith.constant 0 : index
    %61 = vector.load %arg1[%c4, %c0_30, %c0_31] : memref<6x128x128xbf16, #tpu.memory_space<vmem>>, vector<1x128x128xbf16>
    %62 = vector.shape_cast %61 : vector<1x128x128xbf16> to vector<128x128xbf16>
    %cst_32 = arith.constant dense<0.000000e+00> : vector<64x128xf32>
    %63 = tpu.matmul %60, %62, %cst_32 {dimension_numbers = #tpu.dot_dimension_numbers<[1], [0], [0], [1], [0, 0, 1, 1], [], []>} : vector<64x128xbf16>, vector<128x128xbf16>, vector<64x128xf32> -> vector<64x128xf32>
    %c3_33 = arith.constant 3 : index
    %c0_34 = arith.constant 0 : index
    %64 = vector.load %arg2[%c3_33, %c0_34] : memref<8x128xf32, #tpu.memory_space<vmem>>, vector<1x128xf32>
    %65 = vector.broadcast %64 : vector<1x128xf32> to vector<64x128xf32>
    %66 = arith.addf %63, %65 : vector<64x128xf32>
    %cst_35 = arith.constant 0.000000e+00 : f32
    %67 = vector.broadcast %cst_35 : f32 to vector<64x128xf32>
    %68 = arith.maximumf %66, %67 : vector<64x128xf32>
    %69 = arith.truncf %68 : vector<64x128xf32> to vector<64x128xbf16>
    %c5_36 = arith.constant 5 : index
    %c0_37 = arith.constant 0 : index
    %c0_38 = arith.constant 0 : index
    %70 = vector.load %arg1[%c5_36, %c0_37, %c0_38] : memref<6x128x128xbf16, #tpu.memory_space<vmem>>, vector<1x128x128xbf16>
    %71 = vector.shape_cast %70 : vector<1x128x128xbf16> to vector<128x128xbf16>
    %cst_39 = arith.constant dense<0.000000e+00> : vector<64x128xf32>
    %72 = tpu.matmul %69, %71, %cst_39 {dimension_numbers = #tpu.dot_dimension_numbers<[1], [0], [0], [1], [0, 0, 1, 1], [], []>} : vector<64x128xbf16>, vector<128x128xbf16>, vector<64x128xf32> -> vector<64x128xf32>
    %c4_40 = arith.constant 4 : index
    %c0_41 = arith.constant 0 : index
    %73 = vector.load %arg2[%c4_40, %c0_41] : memref<8x128xf32, #tpu.memory_space<vmem>>, vector<1x128xf32>
    %74 = vector.broadcast %73 : vector<1x128xf32> to vector<64x128xf32>
    %75 = arith.addf %72, %74 : vector<64x128xf32>
    %cst_42 = arith.constant dense<0.000000e+00> : vector<64xf32>
    %76 = vector.multi_reduction <add>, %75, %cst_42 [1] : vector<64x128xf32> to vector<64xf32>
    %77 = vector.shape_cast %76 : vector<64xf32> to vector<64x1xf32>
    %78 = vector.extract_strided_slice %35 {offsets = [56, 0], sizes = [8, 1], strides = [1, 1]} : vector<64x1xf32> to vector<8x1xf32>
    %79 = vector.extract_strided_slice %28 {offsets = [56, 0], sizes = [8, 1], strides = [1, 1]} : vector<64x1xf32> to vector<8x1xf32>
    %cst_43 = arith.constant 1.000000e-01 : f32
    %80 = vector.broadcast %cst_43 : f32 to vector<8x1xf32>
    %81 = arith.mulf %80, %79 : vector<8x1xf32>
    %82 = arith.addf %78, %81 : vector<8x1xf32>
    %83 = vector.extract_strided_slice %35 {offsets = [56, 0], sizes = [8, 1], strides = [1, 1]} : vector<64x1xf32> to vector<8x1xf32>
    %84 = vector.extract_strided_slice %35 {offsets = [48, 0], sizes = [8, 1], strides = [1, 1]} : vector<64x1xf32> to vector<8x1xf32>
    %85 = arith.subf %83, %84 : vector<8x1xf32>
    %cst_44 = arith.constant 9.900000e-01 : f32
    %86 = vector.broadcast %cst_44 : f32 to vector<8x1xf32>
    %87 = arith.mulf %86, %82 : vector<8x1xf32>
    %88 = arith.addf %85, %87 : vector<8x1xf32>
    %89 = vector.extract_strided_slice %28 {offsets = [48, 0], sizes = [8, 1], strides = [1, 1]} : vector<64x1xf32> to vector<8x1xf32>
    %cst_45 = arith.constant 1.000000e-01 : f32
    %90 = vector.broadcast %cst_45 : f32 to vector<8x1xf32>
    %91 = arith.mulf %90, %89 : vector<8x1xf32>
    %92 = arith.addf %88, %91 : vector<8x1xf32>
    %93 = vector.extract_strided_slice %35 {offsets = [48, 0], sizes = [8, 1], strides = [1, 1]} : vector<64x1xf32> to vector<8x1xf32>
    %94 = vector.extract_strided_slice %35 {offsets = [40, 0], sizes = [8, 1], strides = [1, 1]} : vector<64x1xf32> to vector<8x1xf32>
    %95 = arith.subf %93, %94 : vector<8x1xf32>
    %cst_46 = arith.constant 9.900000e-01 : f32
    %96 = vector.broadcast %cst_46 : f32 to vector<8x1xf32>
    %97 = arith.mulf %96, %92 : vector<8x1xf32>
    %98 = arith.addf %95, %97 : vector<8x1xf32>
    %99 = vector.extract_strided_slice %28 {offsets = [40, 0], sizes = [8, 1], strides = [1, 1]} : vector<64x1xf32> to vector<8x1xf32>
    %cst_47 = arith.constant 1.000000e-01 : f32
    %100 = vector.broadcast %cst_47 : f32 to vector<8x1xf32>
    %101 = arith.mulf %100, %99 : vector<8x1xf32>
    %102 = arith.addf %98, %101 : vector<8x1xf32>
    %103 = vector.extract_strided_slice %35 {offsets = [40, 0], sizes = [8, 1], strides = [1, 1]} : vector<64x1xf32> to vector<8x1xf32>
    %104 = vector.extract_strided_slice %35 {offsets = [32, 0], sizes = [8, 1], strides = [1, 1]} : vector<64x1xf32> to vector<8x1xf32>
    %105 = arith.subf %103, %104 : vector<8x1xf32>
    %cst_48 = arith.constant 9.900000e-01 : f32
    %106 = vector.broadcast %cst_48 : f32 to vector<8x1xf32>
    %107 = arith.mulf %106, %102 : vector<8x1xf32>
    %108 = arith.addf %105, %107 : vector<8x1xf32>
    %109 = vector.extract_strided_slice %28 {offsets = [32, 0], sizes = [8, 1], strides = [1, 1]} : vector<64x1xf32> to vector<8x1xf32>
    %cst_49 = arith.constant 1.000000e-01 : f32
    %110 = vector.broadcast %cst_49 : f32 to vector<8x1xf32>
    %111 = arith.mulf %110, %109 : vector<8x1xf32>
    %112 = arith.addf %108, %111 : vector<8x1xf32>
    %113 = vector.extract_strided_slice %35 {offsets = [32, 0], sizes = [8, 1], strides = [1, 1]} : vector<64x1xf32> to vector<8x1xf32>
    %114 = vector.extract_strided_slice %35 {offsets = [24, 0], sizes = [8, 1], strides = [1, 1]} : vector<64x1xf32> to vector<8x1xf32>
    %115 = arith.subf %113, %114 : vector<8x1xf32>
    %cst_50 = arith.constant 9.900000e-01 : f32
    %116 = vector.broadcast %cst_50 : f32 to vector<8x1xf32>
    %117 = arith.mulf %116, %112 : vector<8x1xf32>
    %118 = arith.addf %115, %117 : vector<8x1xf32>
    %119 = vector.extract_strided_slice %28 {offsets = [24, 0], sizes = [8, 1], strides = [1, 1]} : vector<64x1xf32> to vector<8x1xf32>
    %cst_51 = arith.constant 1.000000e-01 : f32
    %120 = vector.broadcast %cst_51 : f32 to vector<8x1xf32>
    %121 = arith.mulf %120, %119 : vector<8x1xf32>
    %122 = arith.addf %118, %121 : vector<8x1xf32>
    %123 = vector.extract_strided_slice %35 {offsets = [24, 0], sizes = [8, 1], strides = [1, 1]} : vector<64x1xf32> to vector<8x1xf32>
    %124 = vector.extract_strided_slice %35 {offsets = [16, 0], sizes = [8, 1], strides = [1, 1]} : vector<64x1xf32> to vector<8x1xf32>
    %125 = arith.subf %123, %124 : vector<8x1xf32>
    %cst_52 = arith.constant 9.900000e-01 : f32
    %126 = vector.broadcast %cst_52 : f32 to vector<8x1xf32>
    %127 = arith.mulf %126, %122 : vector<8x1xf32>
    %128 = arith.addf %125, %127 : vector<8x1xf32>
    %129 = vector.extract_strided_slice %28 {offsets = [16, 0], sizes = [8, 1], strides = [1, 1]} : vector<64x1xf32> to vector<8x1xf32>
    %cst_53 = arith.constant 1.000000e-01 : f32
    %130 = vector.broadcast %cst_53 : f32 to vector<8x1xf32>
    %131 = arith.mulf %130, %129 : vector<8x1xf32>
    %132 = arith.addf %128, %131 : vector<8x1xf32>
    %133 = vector.extract_strided_slice %35 {offsets = [16, 0], sizes = [8, 1], strides = [1, 1]} : vector<64x1xf32> to vector<8x1xf32>
    %134 = vector.extract_strided_slice %35 {offsets = [8, 0], sizes = [8, 1], strides = [1, 1]} : vector<64x1xf32> to vector<8x1xf32>
    %135 = arith.subf %133, %134 : vector<8x1xf32>
    %cst_54 = arith.constant 9.900000e-01 : f32
    %136 = vector.broadcast %cst_54 : f32 to vector<8x1xf32>
    %137 = arith.mulf %136, %132 : vector<8x1xf32>
    %138 = arith.addf %135, %137 : vector<8x1xf32>
    %139 = vector.extract_strided_slice %28 {offsets = [8, 0], sizes = [8, 1], strides = [1, 1]} : vector<64x1xf32> to vector<8x1xf32>
    %cst_55 = arith.constant 1.000000e-01 : f32
    %140 = vector.broadcast %cst_55 : f32 to vector<8x1xf32>
    %141 = arith.mulf %140, %139 : vector<8x1xf32>
    %142 = arith.addf %138, %141 : vector<8x1xf32>
    %143 = vector.extract_strided_slice %35 {offsets = [8, 0], sizes = [8, 1], strides = [1, 1]} : vector<64x1xf32> to vector<8x1xf32>
    %144 = vector.extract_strided_slice %35 {offsets = [0, 0], sizes = [8, 1], strides = [1, 1]} : vector<64x1xf32> to vector<8x1xf32>
    %145 = arith.subf %143, %144 : vector<8x1xf32>
    %146 = vector.extract_strided_slice %28 {offsets = [0, 0], sizes = [8, 1], strides = [1, 1]} : vector<64x1xf32> to vector<8x1xf32>
    %cst_56 = arith.constant 1.000000e-01 : f32
    %147 = vector.broadcast %cst_56 : f32 to vector<8x1xf32>
    %148 = arith.mulf %147, %146 : vector<8x1xf32>
    %149 = arith.addf %145, %148 : vector<8x1xf32>
    %150 = vector.extract_strided_slice %77 {offsets = [0, 0], sizes = [8, 1], strides = [1, 1]} : vector<64x1xf32> to vector<8x1xf32>
    %151 = arith.subf %149, %150 : vector<8x1xf32>
    %152 = vector.extract_strided_slice %28 {offsets = [0, 0], sizes = [8, 1], strides = [1, 1]} : vector<64x1xf32> to vector<8x1xf32>
    %153 = vector.extract_strided_slice %77 {offsets = [8, 0], sizes = [8, 1], strides = [1, 1]} : vector<64x1xf32> to vector<8x1xf32>
    %154 = arith.subf %142, %153 : vector<8x1xf32>
    %155 = arith.addf %151, %154 : vector<8x1xf32>
    %156 = vector.extract_strided_slice %28 {offsets = [8, 0], sizes = [8, 1], strides = [1, 1]} : vector<64x1xf32> to vector<8x1xf32>
    %157 = arith.addf %152, %156 : vector<8x1xf32>
    %158 = vector.extract_strided_slice %77 {offsets = [16, 0], sizes = [8, 1], strides = [1, 1]} : vector<64x1xf32> to vector<8x1xf32>
    %159 = arith.subf %132, %158 : vector<8x1xf32>
    %160 = arith.addf %155, %159 : vector<8x1xf32>
    %161 = vector.extract_strided_slice %28 {offsets = [16, 0], sizes = [8, 1], strides = [1, 1]} : vector<64x1xf32> to vector<8x1xf32>
    %162 = arith.addf %157, %161 : vector<8x1xf32>
    %163 = vector.extract_strided_slice %77 {offsets = [24, 0], sizes = [8, 1], strides = [1, 1]} : vector<64x1xf32> to vector<8x1xf32>
    %164 = arith.subf %122, %163 : vector<8x1xf32>
    %165 = arith.addf %160, %164 : vector<8x1xf32>
    %166 = vector.extract_strided_slice %28 {offsets = [24, 0], sizes = [8, 1], strides = [1, 1]} : vector<64x1xf32> to vector<8x1xf32>
    %167 = arith.addf %162, %166 : vector<8x1xf32>
    %168 = vector.extract_strided_slice %77 {offsets = [32, 0], sizes = [8, 1], strides = [1, 1]} : vector<64x1xf32> to vector<8x1xf32>
    %169 = arith.subf %112, %168 : vector<8x1xf32>
    %170 = arith.addf %165, %169 : vector<8x1xf32>
    %171 = vector.extract_strided_slice %28 {offsets = [32, 0], sizes = [8, 1], strides = [1, 1]} : vector<64x1xf32> to vector<8x1xf32>
    %172 = arith.addf %167, %171 : vector<8x1xf32>
    %173 = vector.extract_strided_slice %77 {offsets = [40, 0], sizes = [8, 1], strides = [1, 1]} : vector<64x1xf32> to vector<8x1xf32>
    %174 = arith.subf %102, %173 : vector<8x1xf32>
    %175 = arith.addf %170, %174 : vector<8x1xf32>
    %176 = vector.extract_strided_slice %28 {offsets = [40, 0], sizes = [8, 1], strides = [1, 1]} : vector<64x1xf32> to vector<8x1xf32>
    %177 = arith.addf %172, %176 : vector<8x1xf32>
    %178 = vector.extract_strided_slice %77 {offsets = [48, 0], sizes = [8, 1], strides = [1, 1]} : vector<64x1xf32> to vector<8x1xf32>
    %179 = arith.subf %92, %178 : vector<8x1xf32>
    %180 = arith.addf %175, %179 : vector<8x1xf32>
    %181 = vector.extract_strided_slice %28 {offsets = [48, 0], sizes = [8, 1], strides = [1, 1]} : vector<64x1xf32> to vector<8x1xf32>
    %182 = arith.addf %177, %181 : vector<8x1xf32>
    %183 = vector.extract_strided_slice %77 {offsets = [56, 0], sizes = [8, 1], strides = [1, 1]} : vector<64x1xf32> to vector<8x1xf32>
    %184 = arith.subf %82, %183 : vector<8x1xf32>
    %185 = arith.addf %180, %184 : vector<8x1xf32>
    %186 = vector.extract_strided_slice %28 {offsets = [56, 0], sizes = [8, 1], strides = [1, 1]} : vector<64x1xf32> to vector<8x1xf32>
    %187 = arith.addf %182, %186 : vector<8x1xf32>
    %188 = arith.mulf %185, %187 : vector<8x1xf32>
    %cst_57 = arith.constant dense<0.000000e+00> : vector<1xf32>
    %189 = vector.multi_reduction <add>, %188, %cst_57 [0] : vector<8x1xf32> to vector<1xf32>
    %190 = vector.shape_cast %189 : vector<1xf32> to vector<1x1xf32>
    %cst_58 = arith.constant 0.000000e+00 : f32
    %191 = vector.broadcast %cst_58 : f32 to vector<8x128xf32>
    %cst_59 = arith.constant 1.562500e-02 : f32
    %192 = vector.broadcast %cst_59 : f32 to vector<1x1xf32>
    %193 = arith.mulf %190, %192 : vector<1x1xf32>
    %194 = vector.broadcast %193 : vector<1x1xf32> to vector<8x128xf32>
    %195 = arith.addf %191, %194 : vector<8x128xf32>
    %c0_60 = arith.constant 0 : index
    %c0_61 = arith.constant 0 : index
    %196 = vector.load %arg3[%c0_60, %c0_61] : memref<8x128xf32, #tpu.memory_space<vmem>>, vector<8x128xf32>
    tpu.vector_store %arg3[%c0_60, %c0_61], %195 {strides = array<i32>} : memref<8x128xf32, #tpu.memory_space<vmem>>, vector<8x128xf32>,
    return
  }
}

</mosaic_0001>

<bundles_post_ra>
// kernel: _forward_impl.1
= control target key start
LH: loop header
LB: loop body
LE: loop exit
PB: predicated region body
PF: predicated region fallthrough
CT: control target
= control target key end

     0   :  { %v490_v29 = vlaneseq  ;;  %s1852_s1 = inlined_call_operand.vmem [shape: bf16[6,128,128], index: 1, kind: input, shape index: {}]   ;;  %s1853_s0 = inlined_call_operand.vmem [shape: f32[64,128], index: 0, kind: input, shape index: {}]   ;;  %s1854_s2 = inlined_call_operand.vmem [shape: f32[8,128], index: 2, kind: input, shape index: {}]   ;;  %s1855_s3 = inlined_call_operand.vmem [shape: f32[8,128], index: 3, kind: output, shape index: {}]  }
   0x1   :  { %v1434_v0 = vld [vmem:[%s1852_s1 + $0x38] sm:$0xff]   ;;  %v1435_v1 = vld [vmem:[%s1852_s1 + $0x30] sm:$0xff]   ;;  %v1436_v2 = vld [vmem:[%s1852_s1 + $0x28] sm:$0xff]  }
   0x2   :  { %1289 = vmatprep.subr.bf16.mxu0 %v1434_v0  ;;  %v1437_v3 = vld [vmem:[%s1852_s1 + $0x20] sm:$0xff]   ;;  %v1523_v5 = vld [vmem:[%s1853_s0 + $0x8] sm:$0xff]  ;;  %v1438_v7 = vld [vmem:[%s1852_s1 + $0x18] sm:$0xff]   ;;  %v1611_v32 = vand.u32 127, %v490_v29 }
   0x3   :  { %1290 = vmatpush3.bf16.msra.mxu0 %v1434_v0  ;;  %v1518_v4 = vld [vmem:[%s1853_s0] sm:$0xff]  ;;  %v1442_v8 = vld [vmem:[%s1852_s1 + $0x78] sm:$0xff]   ;;  %v1443_v9 = vld [vmem:[%s1852_s1 + $0x70] sm:$0xff]  }
   0x4   :  { %1291 = vmatprep.subr.bf16.mxu0 %v1435_v1  ;;  %v23_v6 = vpack.c.bf16 %v1523_v5, %v1518_v4  ;;  %1313 = vmatprep.subr.bf16.mxu1 %v1442_v8  ;;  %v1439_v10 = vld [vmem:[%s1852_s1 + $0x10] sm:$0xff]   ;;  %v1444_v11 = vld [vmem:[%s1852_s1 + $0x68] sm:$0xff]   ;;  %v1445_v12 = vld [vmem:[%s1852_s1 + $0x60] sm:$0xff]   ;;  %vm517_vm0 = vcmp.eq.s32.totalorder %v1611_v32, 10  ;;  %vm492_vm1 = vcmp.eq.s32.totalorder %v1611_v32, 6 }
   0x5   :  { %1314 = vmatpush3.bf16.msra.mxu1 %v1442_v8  ;;  %v1440_v13 = vld [vmem:[%s1852_s1 + $0x8] sm:$0xff]   ;;  %v1446_v14 = vld [vmem:[%s1852_s1 + $0x58] sm:$0xff]   ;;  %v1441_v15 = vld [vmem:[%s1852_s1] sm:$0xff]   ;;  %v518_v34 = vsel %vm517_vm0, %v1518_v4, 0.0  ;;  %v519_v36 = vsel %vm517_vm0, %v1523_v5, 0.0 }
   0x6   :  { %1305 = vmatprep.mubr.bf16.mxu0 %v23_v6  ;;  %1315 = vmatprep.subr.bf16.mxu1 %v1443_v9  ;;  %v1557_v16 = vld [vmem:[%s1853_s0 + $0x10] sm:$0xff]  ;;  %v1562_v17 = vld [vmem:[%s1853_s0 + $0x18] sm:$0xff]  ;;  %v1567_v18 = vld [vmem:[%s1853_s0 + $0x20] sm:$0xff] }
   0x7   :  { %1292 = vmatpush3.bf16.msra.mxu0 %v1435_v1  ;;  %v1572_v19 = vld [vmem:[%s1853_s0 + $0x28] sm:$0xff]  ;;  %v24_v20 = vpack.c.bf16 %v1562_v17, %v1557_v16  ;;  %v1581_v22 = vld [vmem:[%s1853_s0 + $0x30] sm:$0xff]  ;;  %v1586_v23 = vld [vmem:[%s1853_s0 + $0x38] sm:$0xff]  ;;  %v520_v35 = vsel %vm517_vm0, %v1557_v16, 0.0  ;;  %526 = vadd.xlane.f32.xlu0 %v518_v34  ;;  %v521_v37 = vsel %vm517_vm0, %v1562_v17, 0.0  ;;  %v522_v39 = vsel %vm517_vm0, %v1567_v18, 0.0 }
   0x8   :  { %1293 = vmatprep.subr.bf16.mxu0 %v1436_v2  ;;  %v25_v21 = vpack.c.bf16 %v1572_v19, %v1567_v18  ;;  %v26_v24 = vpack.c.bf16 %v1586_v23, %v1581_v22  ;;  %v1447_v25 = vld [vmem:[%s1852_s1 + $0x50] sm:$0xff]   ;;  %v1448_v26 = vld [vmem:[%s1852_s1 + $0x48] sm:$0xff]   ;;  %v1449_v27 = vld [vmem:[%s1852_s1 + $0x40] sm:$0xff]   ;;  %530 = vadd.xlane.f32.xlu1 %v520_v35  ;;  %v523_v40 = vsel %vm517_vm0, %v1572_v19, 0.0  ;;  %v524_v42 = vsel %vm517_vm0, %v1581_v22, 0.0 }
   0x9   :  { %1316 = vmatpush3.bf16.msra.mxu1 %v1443_v9  ;;  %v1602_v28 = vld [vmem:[%s1852_s1 + $0xf8] sm:$0xff]   ;;  %v1459_v31 = vld [vmem:[%s1852_s1 + $0xb0] sm:$0xff]   ;;  %v1460_v33 = vld [vmem:[%s1852_s1 + $0xa8] sm:$0xff]   ;;  %v525_v43 = vsel %vm517_vm0, %v1586_v23, 0.0 }
   0xa   :  { %1317 = vmatprep.subr.bf16.mxu1 %v1444_v11  ;;  %v1458_v30 = vld [vmem:[%s1852_s1 + $0xb8] sm:$0xff]   ;;  %v1461_v38 = vld [vmem:[%s1852_s1 + $0xa0] sm:$0xff]   ;;  %v1451_v0 = vld [vmem:[%s1852_s1 + $0xf0] sm:$0xff]  }
   0xb   :  { %1294 = vmatpush3.bf16.msra.mxu0 %v1436_v2  ;;  %528 = vadd.xlane.f32.xlu0 %v519_v36  ;;  %v1462_v41 = vld [vmem:[%s1852_s1 + $0x98] sm:$0xff]   ;;  %v1083_v46 = vld [vmem:[%s1854_s2] ss:$0 sm:$0xff]  ;;  %v1452_v9 = vld [vmem:[%s1852_s1 + $0xe8] sm:$0xff]  }
   0xc   :  { %1295 = vmatprep.subr.bf16.mxu0 %v1437_v3  ;;  %532 = vadd.xlane.f32.xlu1 %v521_v37  ;;  %v1463_v29 = vld [vmem:[%s1852_s1 + $0x90] sm:$0xff]   ;;  %v1108_v36 = vld [vmem:[%s1854_s2 + $0x1] ss:$0 sm:$0xff] }
   0xd   :  { %1318 = vmatpush3.bf16.msra.mxu1 %v1444_v11 }
   0xe   :  { %1319 = vmatprep.subr.bf16.mxu1 %v1445_v12 }
   0xf   :  { %1296 = vmatpush3.bf16.msra.mxu0 %v1437_v3  ;;  %534 = vadd.xlane.f32.xlu0 %v522_v39 }
  0x10   :  { %1297 = vmatprep.subr.bf16.mxu0 %v1438_v7  ;;  %536 = vadd.xlane.f32.xlu1 %v523_v40 }
  0x11   :  { %1320 = vmatpush3.bf16.msra.mxu1 %v1445_v12 }
  0x12   :  { %1321 = vmatprep.subr.bf16.mxu1 %v1446_v14 }
  0x13   :  { %1298 = vmatpush3.bf16.msra.mxu0 %v1438_v7  ;;  %538 = vadd.xlane.f32.xlu0 %v524_v42 }
  0x14   :  { %1299 = vmatprep.subr.bf16.mxu0 %v1439_v10  ;;  %540 = vadd.xlane.f32.xlu1 %v525_v43 }
  0x15   :  { %1322 = vmatpush3.bf16.msra.mxu1 %v1446_v14  ;;  %v1453_v14 = vld [vmem:[%s1852_s1 + $0xe0] sm:$0xff]  }
  0x16   :  { %1323 = vmatprep.subr.bf16.mxu1 %v1447_v25 }
  0x17   :  { %1300 = vmatpush3.bf16.msra.mxu0 %v1439_v10 }
  0x18   :  { %1301 = vmatprep.subr.bf16.mxu0 %v1440_v13 }
  0x19   :  { %1324 = vmatpush3.bf16.msra.mxu1 %v1447_v25  ;;  %v543_v25 = vpack.c.bf16 %v1567_v18, %v1562_v17 }
  0x1a   :  { %1325 = vmatprep.subr.bf16.mxu1 %v1448_v26 }
  0x1b   :  { %1302 = vmatpush3.bf16.msra.mxu0 %v1440_v13  ;;  %v542_v13 = vpack.c.bf16 %v1557_v16, %v1523_v5 }
  0x1c   :  { %1303 = vmatprep.subr.bf16.mxu0 %v1441_v15 }
  0x1d   :  { %1326 = vmatpush3.bf16.msra.mxu1 %v1448_v26  ;;  %v544_v26 = vpack.c.bf16 %v1581_v22, %v1572_v19 }
  0x1e   :  { %1327 = vmatprep.subr.bf16.mxu1 %v1449_v27 }
  0x1f   :  { %1304 = vmatpush3.bf16.msra.mxu0 %v1441_v15  ;;  %v1454_v15 = vld [vmem:[%s1852_s1 + $0xd8] sm:$0xff]  }
  0x20   :  { %1337 = vmatprep.subr.bf16.mxu0 %v1458_v30 }
  0x21   :  { %1328 = vmatpush3.bf16.msra.mxu1 %v1449_v27  ;;  %v1482_v27 = vmov 0.0  }
  0x22   :  { %1306 = vmatmul.mubr.bf16.vlgmr.msra.gmra.mxu0 %v24_v20  ;;  %1361 = vmatprep.subr.bf16.mxu1 %v1602_v28  ;;  %v1455_v20 = vld [vmem:[%s1852_s1 + $0xd0] sm:$0xff]  }
  0x23   :  { %1309 = vmatprep.mubr.bf16.mxu0 %v25_v21  ;;  %1338 = vmatpush3.bf16.msra.mxu0 %v1458_v30  ;;  %v1456_v21 = vld [vmem:[%s1852_s1 + $0xc8] sm:$0xff]  }
  0x24   :  { %1339 = vmatprep.subr.bf16.mxu0 %v1459_v31  ;;  %v1464_v30 = vld [vmem:[%s1852_s1 + $0x88] sm:$0xff]  }
  0x27   :  { %1340 = vmatpush3.bf16.msra.mxu0 %v1459_v31  ;;  %v1465_v31 = vld [vmem:[%s1852_s1 + $0x80] sm:$0xff]  }
  0x28   :  { %1341 = vmatprep.subr.bf16.mxu0 %v1460_v33 }
  0x2a   :  { %1310 = vmatmul.mubr.bf16.gmra.mxu0 %v26_v24  ;;  %v1457_v24 = vld [vmem:[%s1852_s1 + $0xc0] sm:$0xff]  }
  0x2b   :  { %1342 = vmatpush3.bf16.msra.mxu0 %v1460_v33  ;;  %v1466_v33 = vld [vmem:[%s1852_s1 + $0x138] sm:$0xff]  }
  0x2c   :  { %1343 = vmatprep.subr.bf16.mxu0 %v1461_v38 }
  0x2f   :  { %1344 = vmatpush3.bf16.msra.mxu0 %v1461_v38 }
  0x30   :  { %1345 = vmatprep.subr.bf16.mxu0 %v1462_v41 }
  0x33   :  { %1346 = vmatpush3.bf16.msra.mxu0 %v1462_v41 }
  0x34   :  { %1347 = vmatprep.subr.bf16.mxu0 %v1463_v29 }
  0x37   :  { %1348 = vmatpush3.bf16.msra.mxu0 %v1463_v29  ;;  %v1473_v29 = vld [vmem:[%s1852_s1 + $0x100] sm:$0xff]  }
  0x38   :  { %1349 = vmatprep.subr.bf16.mxu0 %v1464_v30 }
  0x3b   :  { %1350 = vmatpush3.bf16.msra.mxu0 %v1464_v30  ;;  %v1166_v30 = vld [vmem:[%s1854_s2 + $0x2] ss:$0 sm:$0xff] }
  0x3c   :  { %1351 = vmatprep.subr.bf16.mxu0 %v1465_v31 }
  0x3f   :  { %1352 = vmatpush3.bf16.msra.mxu0 %v1465_v31 }
  0x40   :  { %1385 = vmatprep.subr.bf16.mxu0 %v1466_v33 }
  0xe2   :  { %v1307_v44 = vpop.f32.mrf.mxu0 }
  0xe3   :  { %v139_v50 = vadd.f32 %v1307_v44, %v1083_v46 }
  0xe4   :  { %v130_v45 = vpop.f32.mrf.mxu0 }
  0xe5   :  { %v131_v48 = vadd.f32 %v1083_v46, %v130_v45  ;;  %v163_v57 = vmax.f32 %v139_v50, 0.0 }
  0xe6   :  { %v1308_v47 = vpop.f32.mrf.mxu0 }
  0xe7   :  { %v142_v49 = vadd.f32 %v1308_v47, %v1083_v46  ;;  %v161_v55 = vmax.f32 %v131_v48, 0.0 }
  0xe8   :  { %v133_v51 = vpop.f32.mrf.mxu0 }
  0xe9   :  { %v134_v52 = vadd.f32 %v1083_v46, %v133_v51  ;;  %v164_v53 = vmax.f32 %v142_v49, 0.0 }
  0xea   :  { %v1311_v54 = vpop.f32.mrf.mxu0 }
  0xeb   :  { %v162_v56 = vmax.f32 %v134_v52, 0.0  ;;  %v155_v58 = vadd.f32 %v1311_v54, %v1083_v46  ;;  %v170_v62 = vpack.c.bf16 %v164_v53, %v163_v57  ;;  %v1467_v54 = vld [vmem:[%s1852_s1 + $0x130] sm:$0xff]  }
  0xec   :  { %v146_v59 = vpop.f32.mrf.mxu0 }
  0xed   :  { %v147_v60 = vadd.f32 %v1083_v46, %v146_v59  ;;  %v169_v61 = vpack.c.bf16 %v162_v56, %v161_v55  ;;  %v167_v2 = vmax.f32 %v155_v58, 0.0 }
  0xee   :  { %v1312_v63 = vpop.f32.mrf.mxu0 }
  0xef   :  { %v158_v1 = vadd.f32 %v1312_v63, %v1083_v46  ;;  %1329 = vmatprep.mubr.bf16.mxu1 %v169_v61  ;;  %v165_v6 = vmax.f32 %v147_v60, 0.0  ;;  %v1468_v61 = vld [vmem:[%s1852_s1 + $0x128] sm:$0xff]  }
  0xf0   :  { %v149_v3 = vpop.f32.mrf.mxu0  ;;  %1330 = vmatmul.mubr.bf16.vlgmr.msra.gmra.mxu1 %v170_v62 }
  0xf1   :  { %v168_v7 = vmax.f32 %v158_v1, 0.0  ;;  %v150_v8 = vadd.f32 %v1083_v46, %v149_v3  ;;  %1362 = vmatpush3.bf16.msra.mxu1 %v1602_v28  ;;  %v545_v28 = vpack.c.bf16 %v1586_v23, %v1482_v27  ;;  %v527_v1 = vpop.xlane.xlu0 %526  ;;  %v531_v3 = vpop.xlane.xlu1 %530 }
  0xf2   :  { %1363 = vmatprep.subr.bf16.mxu1 %v1451_v0 }
  0xf3   :  { %v166_v10 = vmax.f32 %v150_v8, 0.0  ;;  %v172_v11 = vpack.c.bf16 %v168_v7, %v167_v2  ;;  %v1469_v2 = vld [vmem:[%s1852_s1 + $0x120] sm:$0xff]  }
  0xf5   :  { %v171_v12 = vpack.c.bf16 %v166_v10, %v165_v6  ;;  %1364 = vmatpush3.bf16.msra.mxu1 %v1451_v0  ;;  %v1470_v6 = vld [vmem:[%s1852_s1 + $0x118] sm:$0xff]   ;;  %v529_v7 = vpop.xlane.xlu0 %528  ;;  %v533_v8 = vpop.xlane.xlu1 %532  ;;  %v1157_v10 = vld [vmem:[%s1854_s2 + $0x5] ss:$0 sm:$0xff] }
  0xf6   :  { %1365 = vmatprep.subr.bf16.mxu1 %v1452_v9 }
  0xf7   :  { %1333 = vmatprep.mubr.bf16.mxu1 %v171_v12 }
  0xf8   :  { %1334 = vmatmul.mubr.bf16.gmra.mxu1 %v172_v11  ;;  %v568_v11 = vmul.f32 %v1157_v10, %v527_v1 }
  0xf9   :  { %1366 = vmatpush3.bf16.msra.mxu1 %v1452_v9  ;;  %1377 = vmatprep.mubr.bf16.mxu1 %v542_v13  ;;  %v1471_v9 = vld [vmem:[%s1852_s1 + $0x110] sm:$0xff]   ;;  %v535_v12 = vpop.xlane.xlu0 %534  ;;  %v570_v13 = vmul.f32 %v1157_v10, %v531_v3 }
  0xfa   :  { %1367 = vmatprep.subr.bf16.mxu1 %v1453_v14 }
  0xfd   :  { %1368 = vmatpush3.bf16.msra.mxu1 %v1453_v14 }
  0xfe   :  { %1369 = vmatprep.subr.bf16.mxu1 %v1454_v15 }
 0x101   :  { %1370 = vmatpush3.bf16.msra.mxu1 %v1454_v15  ;;  %v537_v15 = vpop.xlane.xlu1 %536 }
 0x102   :  { %1371 = vmatprep.subr.bf16.mxu1 %v1455_v20 }
 0x105   :  { %1372 = vmatpush3.bf16.msra.mxu1 %v1455_v20  ;;  %v1472_v20 = vld [vmem:[%s1852_s1 + $0x108] sm:$0xff]  }
 0x106   :  { %1373 = vmatprep.subr.bf16.mxu1 %v1456_v21 }
 0x109   :  { %1374 = vmatpush3.bf16.msra.mxu1 %v1456_v21  ;;  %v571_v21 = vmul.f32 %v1157_v10, %v533_v8 }
 0x10a   :  { %1375 = vmatprep.subr.bf16.mxu1 %v1457_v24 }
 0x10d   :  { %1376 = vmatpush3.bf16.msra.mxu1 %v1457_v24 }
 0x110   :  { %1378 = vmatmul.mubr.bf16.vlgmr.msra.gmra.mxu1 %v543_v25  ;;  %v569_v25 = vmul.f32 %v1157_v10, %v529_v7 }
 0x111   :  { %1381 = vmatprep.mubr.bf16.mxu1 %v544_v26 }
 0x118   :  { %1382 = vmatmul.mubr.bf16.gmra.mxu1 %v545_v28 }
 0x1b0   :  { %v1331_v34 = vpop.f32.mrf.mxu1 }
 0x1b1   :  { %v286_v40 = vadd.f32 %v1331_v34, %v1108_v36 }
 0x1b2   :  { %v277_v35 = vpop.f32.mrf.mxu1 }
 0x1b3   :  { %v278_v38 = vadd.f32 %v1108_v36, %v277_v35  ;;  %v1704_v47 = vsub.f32 %v1557_v16, %v286_v40  ;;  %v541_v35 = vpop.xlane.xlu1 %540 }
 0x1b4   :  { %v1332_v37 = vpop.f32.mrf.mxu1 }
 0x1b5   :  { %v289_v39 = vadd.f32 %v1332_v37, %v1108_v36  ;;  %v1698_v45 = vsub.f32 %v1518_v4, %v278_v38 }
 0x1b6   :  { %v280_v41 = vpop.f32.mrf.mxu1 }
 0x1b7   :  { %v281_v42 = vadd.f32 %v1108_v36, %v280_v41  ;;  %v1695_v43 = vsub.f32 %v1562_v17, %v289_v39 }
 0x1b8   :  { %v1335_v44 = vpop.f32.mrf.mxu1 }
 0x1b9   :  { %v1701_v46 = vsub.f32 %v1523_v5, %v281_v42  ;;  %v302_v48 = vadd.f32 %v1335_v44, %v1108_v36  ;;  %v317_v52 = vpack.c.bf16 %v1695_v43, %v1704_v47 }
 0x1ba   :  { %v293_v49 = vpop.f32.mrf.mxu1 }
 0x1bb   :  { %v294_v50 = vadd.f32 %v1108_v36, %v293_v49  ;;  %v316_v51 = vpack.c.bf16 %v1701_v46, %v1698_v45  ;;  %v1714_v56 = vsub.f32 %v1581_v22, %v302_v48  ;;  %v575_v48 = vmul.f32 %v1157_v10, %v541_v35 }
 0x1bc   :  { %v1336_v53 = vpop.f32.mrf.mxu1 }
 0x1bd   :  { %v305_v55 = vadd.f32 %v1336_v53, %v1108_v36  ;;  %1353 = vmatprep.mubr.bf16.mxu0 %v316_v51  ;;  %v1717_v58 = vsub.f32 %v1567_v18, %v294_v50 }
 0x1be   :  { %v296_v57 = vpop.f32.mrf.mxu1  ;;  %1354 = vmatmul.mubr.bf16.vlgmr.msra.gmra.mxu0 %v317_v52 }
 0x1bf   :  { %v1720_v59 = vsub.f32 %v1586_v23, %v305_v55  ;;  %v297_v60 = vadd.f32 %v1108_v36, %v296_v57  ;;  %1386 = vmatpush3.bf16.msra.mxu0 %v1466_v33  ;;  %v539_v33 = vpop.xlane.xlu0 %538  ;;  %v572_v36 = vmul.f32 %v1157_v10, %v535_v12 }
 0x1c0   :  { %1387 = vmatprep.subr.bf16.mxu0 %v1467_v54  ;;  %v574_v41 = vmul.f32 %v1157_v10, %v539_v33 }
 0x1c1   :  { %v1726_v62 = vsub.f32 %v1572_v19, %v297_v60  ;;  %v319_v63 = vpack.c.bf16 %v1720_v59, %v1714_v56  ;;  %v573_v60 = vmul.f32 %v1157_v10, %v537_v15  ;;  %v1474_v10 = vld [vmem:[%s1852_s1 + $0x178] sm:$0xff]   ;;  %v1475_v15 = vld [vmem:[%s1852_s1 + $0x170] sm:$0xff]  }
 0x1c2   :  { %1409 = vmatprep.subr.bf16.mxu1 %v1474_v10 }
 0x1c3   :  { %1388 = vmatpush3.bf16.msra.mxu0 %v1467_v54  ;;  %v318_v0 = vpack.c.bf16 %v1726_v62, %v1717_v58  ;;  %1410 = vmatpush3.bf16.msra.mxu1 %v1474_v10 }
 0x1c4   :  { %1389 = vmatprep.subr.bf16.mxu0 %v1468_v61  ;;  %1411 = vmatprep.subr.bf16.mxu1 %v1475_v15 }
 0x1c5   :  { %1357 = vmatprep.mubr.bf16.mxu0 %v318_v0 }
 0x1c6   :  { %1358 = vmatmul.mubr.bf16.gmra.mxu0 %v319_v63 }
 0x1c7   :  { %1390 = vmatpush3.bf16.msra.mxu0 %v1468_v61  ;;  %1412 = vmatpush3.bf16.msra.mxu1 %v1475_v15 }
 0x1c8   :  { %1391 = vmatprep.subr.bf16.mxu0 %v1469_v2 }
 0x1cb   :  { %1392 = vmatpush3.bf16.msra.mxu0 %v1469_v2 }
 0x1cc   :  { %1393 = vmatprep.subr.bf16.mxu0 %v1470_v6 }
 0x1cf   :  { %1394 = vmatpush3.bf16.msra.mxu0 %v1470_v6 }
 0x1d0   :  { %v1379_v14 = vpop.f32.mrf.mxu1  ;;  %1395 = vmatprep.subr.bf16.mxu0 %v1471_v9 }
 0x1d1   :  { %v667_v27 = vadd.f32 %v1379_v14, %v570_v13 }
 0x1d2   :  { %v658_v24 = vpop.f32.mrf.mxu1 }
 0x1d3   :  { %v659_v26 = vadd.f32 %v658_v24, %v568_v11  ;;  %1396 = vmatpush3.bf16.msra.mxu0 %v1471_v9  ;;  %v696_v40 = vadd.f32 %v1166_v30, %v667_v27  ;;  %v1477_v24 = vld [vmem:[%s1852_s1 + $0x160] sm:$0xff]   ;;  %v1480_v27 = vld [vmem:[%s1852_s1 + $0x148] sm:$0xff]  }
 0x1d4   :  { %v1380_v28 = vpop.f32.mrf.mxu1  ;;  %1397 = vmatprep.subr.bf16.mxu0 %v1472_v20 }
 0x1d5   :  { %v670_v31 = vadd.f32 %v1380_v28, %v571_v21  ;;  %v694_v37 = vadd.f32 %v1166_v30, %v659_v26  ;;  %v704_v54 = vmax.f32 %v696_v40, 0.0  ;;  %v1476_v21 = vld [vmem:[%s1852_s1 + $0x168] sm:$0xff]   ;;  %v1479_v26 = vld [vmem:[%s1852_s1 + $0x150] sm:$0xff]   ;;  %v1481_v28 = vld [vmem:[%s1852_s1 + $0x140] sm:$0xff]   ;;  %v498_v40 = vsel %vm492_vm1, %v1572_v19, 0.0 }
 0x1d6   :  { %v661_v34 = vpop.f32.mrf.mxu1  ;;  %1413 = vmatprep.subr.bf16.mxu1 %v1476_v21 }
 0x1d7   :  { %v697_v38 = vadd.f32 %v1166_v30, %v670_v31  ;;  %v662_v39 = vadd.f32 %v661_v34, %v569_v25  ;;  %1398 = vmatpush3.bf16.msra.mxu0 %v1472_v20  ;;  %v702_v51 = vmax.f32 %v694_v37, 0.0  ;;  %1414 = vmatpush3.bf16.msra.mxu1 %v1476_v21  ;;  %v1478_v25 = vld [vmem:[%s1852_s1 + $0x158] sm:$0xff]  }
 0x1d8   :  { %v1383_v42 = vpop.f32.mrf.mxu1  ;;  %1399 = vmatprep.subr.bf16.mxu0 %v1473_v29  ;;  %1415 = vmatprep.subr.bf16.mxu1 %v1477_v24 }
 0x1d9   :  { %v695_v44 = vadd.f32 %v1166_v30, %v662_v39  ;;  %v705_v49 = vmax.f32 %v697_v38, 0.0  ;;  %v683_v55 = vadd.f32 %v1383_v42, %v574_v41  ;;  %v499_v38 = vsel %vm492_vm1, %v1581_v22, 0.0 }
 0x1da   :  { %v674_v50 = vpop.f32.mrf.mxu1  ;;  %v497_v42 = vsel %vm492_vm1, %v1567_v18, 0.0 }
 0x1db   :  { %v703_v52 = vmax.f32 %v695_v44, 0.0  ;;  %v675_v53 = vadd.f32 %v674_v50, %v572_v36  ;;  %1400 = vmatpush3.bf16.msra.mxu0 %v1473_v29  ;;  %v711_v0 = vpack.c.bf16 %v705_v49, %v704_v54  ;;  %v700_v7 = vadd.f32 %v1166_v30, %v683_v55  ;;  %1416 = vmatpush3.bf16.msra.mxu1 %v1477_v24 }
 0x1dc   :  { %v1384_v57 = vpop.f32.mrf.mxu1  ;;  %1417 = vmatprep.subr.bf16.mxu1 %v1478_v25 }
 0x1dd   :  { %v686_v61 = vadd.f32 %v1384_v57, %v575_v48  ;;  %v710_v63 = vpack.c.bf16 %v703_v52, %v702_v51  ;;  %v698_v2 = vadd.f32 %v1166_v30, %v675_v53  ;;  %v708_v13 = vmax.f32 %v700_v7, 0.0 }
 0x1de   :  { %v677_v1 = vpop.f32.mrf.mxu1  ;;  %v494_v52 = vsel %vm492_vm1, %v1523_v5, 0.0 }
 0x1df   :  { %v701_v3 = vadd.f32 %v1166_v30, %v686_v61  ;;  %v678_v6 = vadd.f32 %v677_v1, %v573_v60  ;;  %1401 = vmatprep.mubr.bf16.mxu0 %v710_v63  ;;  %v706_v11 = vmax.f32 %v698_v2, 0.0  ;;  %1418 = vmatpush3.bf16.msra.mxu1 %v1478_v25 }
 0x1e0   :  { %1402 = vmatmul.mubr.bf16.vlgmr.msra.gmra.mxu0 %v711_v0  ;;  %1419 = vmatprep.subr.bf16.mxu1 %v1479_v26 }
 0x1e1   :  { %v699_v8 = vadd.f32 %v1166_v30, %v678_v6  ;;  %v709_v9 = vmax.f32 %v701_v3, 0.0 }
 0x1e3   :  { %v707_v12 = vmax.f32 %v699_v8, 0.0  ;;  %v713_v20 = vpack.c.bf16 %v709_v9, %v708_v13  ;;  %1420 = vmatpush3.bf16.msra.mxu1 %v1479_v26 }
 0x1e4   :  { %1421 = vmatprep.subr.bf16.mxu1 %v1480_v27 }
 0x1e5   :  { %v712_v14 = vpack.c.bf16 %v707_v12, %v706_v11 }
 0x1e7   :  { %1405 = vmatprep.mubr.bf16.mxu0 %v712_v14  ;;  %1422 = vmatpush3.bf16.msra.mxu1 %v1480_v27  ;;  %v1208_v14 = vld [vmem:[%s1854_s2 + $0x4] ss:$0 sm:$0xff] }
 0x1e8   :  { %1406 = vmatmul.mubr.bf16.gmra.mxu0 %v713_v20  ;;  %1423 = vmatprep.subr.bf16.mxu1 %v1481_v28 }
 0x1eb   :  { %1424 = vmatpush3.bf16.msra.mxu1 %v1481_v28 }
 0x27e   :  { %v1355_v29 = vpop.f32.mrf.mxu0 }
 0x27f   :  { %v452_v18 = vmul.f32 %v1355_v29, %v1704_v47 }
 0x280   :  { %v419_v30 = vpop.f32.mrf.mxu0 }
 0x281   :  { %v450_v49 = vmul.f32 %v419_v30, %v1698_v45 }
 0x282   :  { %v1356_v31 = vpop.f32.mrf.mxu0 }
 0x283   :  { %v453_v44 = vmul.f32 %v1356_v31, %v1695_v43 }
 0x284   :  { %v422_v33 = vpop.f32.mrf.mxu0 }
 0x286   :  { %v1359_v34 = vpop.f32.mrf.mxu0 }
 0x287   :  { %v456_v35 = vmul.f32 %v1359_v34, %v1714_v56  ;;  %v500_v56 = vsel %vm492_vm1, %v1586_v23, 0.0  ;;  %v495_v23 = vsel %vm492_vm1, %v1557_v16, 0.0  ;;  %v1183_v16 = vld [vmem:[%s1854_s2 + $0x3] ss:$0 sm:$0xff] }
 0x288   :  { %v435_v36 = vpop.f32.mrf.mxu0 }
 0x289   :  { %470 = vadd.xlane.f32.xlu1 %v456_v35  ;;  %v454_v19 = vmul.f32 %v435_v36, %v1717_v58  ;;  %v493_v58 = vsel %vm492_vm1, %v1518_v4, 0.0 }
 0x28a   :  { %v1360_v37 = vpop.f32.mrf.mxu0 }
 0x28b   :  { %v457_v39 = vmul.f32 %v1360_v37, %v1720_v59  ;;  %v496_v59 = vsel %vm492_vm1, %v1562_v17, 0.0 }
 0x28c   :  { %v438_v41 = vpop.f32.mrf.mxu0 }
 0x28d   :  { %513 = vadd.xlane.f32.xlu1 %v499_v38  ;;  %472 = vadd.xlane.f32.xlu0 %v457_v39  ;;  %v455_v22 = vmul.f32 %v438_v41, %v1726_v62  ;;  %v451_v62 = vmul.f32 %v422_v33, %v1701_v46 }
 0x291   :  { %511 = vadd.xlane.f32.xlu1 %v498_v40  ;;  %515 = vadd.xlane.f32.xlu0 %v500_v56 }
 0x295   :  { %509 = vadd.xlane.f32.xlu1 %v497_v42  ;;  %468 = vadd.xlane.f32.xlu0 %v455_v22 }
 0x299   :  { %507 = vadd.xlane.f32.xlu1 %v496_v59  ;;  %466 = vadd.xlane.f32.xlu0 %v454_v19 }
 0x29d   :  { %505 = vadd.xlane.f32.xlu1 %v495_v23  ;;  %464 = vadd.xlane.f32.xlu0 %v453_v44 }
 0x2a0   :  { %v1403_v48 = vpop.f32.mrf.mxu0 }
 0x2a1   :  { %460 = vadd.xlane.f32.xlu1 %v451_v62  ;;  %462 = vadd.xlane.f32.xlu0 %v452_v18  ;;  %v827_v46 = vadd.f32 %v1403_v48, %v1183_v16 }
 0x2a2   :  { %v818_v17 = vpop.f32.mrf.mxu0 }
 0x2a3   :  { %v819_v50 = vadd.f32 %v1183_v16, %v818_v17  ;;  %v851_v57 = vmax.f32 %v827_v46, 0.0 }
 0x2a4   :  { %v1404_v43 = vpop.f32.mrf.mxu0 }
 0x2a5   :  { %v830_v51 = vadd.f32 %v1404_v43, %v1183_v16  ;;  %458 = vadd.xlane.f32.xlu0 %v450_v49  ;;  %501 = vadd.xlane.f32.xlu1 %v493_v58  ;;  %v849_v55 = vmax.f32 %v819_v50, 0.0 }
 0x2a6   :  { %v821_v47 = vpop.f32.mrf.mxu0 }
 0x2a7   :  { %v822_v53 = vadd.f32 %v1183_v16, %v821_v47  ;;  %v852_v54 = vmax.f32 %v830_v51, 0.0 }
 0x2a8   :  { %v1407_v4 = vpop.f32.mrf.mxu0 }
 0x2a9   :  { %v850_v45 = vmax.f32 %v822_v53, 0.0  ;;  %503 = vadd.xlane.f32.xlu0 %v494_v52  ;;  %v858_v63 = vpack.c.bf16 %v852_v54, %v851_v57  ;;  %v843_v3 = vadd.f32 %v1407_v4, %v1183_v16 }
 0x2aa   :  { %v834_v60 = vpop.f32.mrf.mxu0 }
 0x2ab   :  { %v857_v61 = vpack.c.bf16 %v850_v45, %v849_v55  ;;  %v835_v1 = vadd.f32 %v1183_v16, %v834_v60  ;;  %v855_v9 = vmax.f32 %v843_v3, 0.0 }
 0x2ac   :  { %v1408_v0 = vpop.f32.mrf.mxu0 }
 0x2ad   :  { %v846_v2 = vadd.f32 %v1408_v0, %v1183_v16  ;;  %1425 = vmatprep.mubr.bf16.mxu1 %v857_v61  ;;  %v853_v5 = vmax.f32 %v835_v1, 0.0 }
 0x2ae   :  { %v837_v6 = vpop.f32.mrf.mxu0  ;;  %1426 = vmatmul.mubr.bf16.vlgmr.msra.gmra.mxu1 %v858_v63 }
 0x2af   :  { %v838_v7 = vadd.f32 %v1183_v16, %v837_v6  ;;  %v856_v32 = vmax.f32 %v846_v2, 0.0 }
 0x2b1   :  { %v854_v8 = vmax.f32 %v838_v7, 0.0  ;;  %v860_v12 = vpack.c.bf16 %v856_v32, %v855_v9 }
 0x2b3   :  { %v859_v11 = vpack.c.bf16 %v854_v8, %v853_v5 }
 0x2b5   :  { %1429 = vmatprep.mubr.bf16.mxu1 %v859_v11 }
 0x2b6   :  { %1430 = vmatmul.mubr.bf16.gmra.mxu1 %v860_v12 }
 0x312   :  { %v471_v40 = vpop.xlane.xlu1 %470 }
 0x313   :  { %v1823_v42 = vmul.f32 0.5, %v471_v40 }
 0x315   :  { %v488_v23 = vsub.f32 -0.4515827, %v1823_v42 }
 0x316   :  { %v473_v36 = vpop.xlane.xlu0 %472  ;;  %v514_v22 = vpop.xlane.xlu1 %513 }
 0x317   :  { %v1816_v37 = vmul.f32 0.5, %v473_v36  ;;  %v1017_v18 = vmul.f32 0.1, %v488_v23 }
 0x319   :  { %v489_v38 = vsub.f32 -0.4515827, %v1816_v37 }
 0x31a   :  { %v516_v56 = vpop.xlane.xlu0 %515  ;;  %v512_v58 = vpop.xlane.xlu1 %511 }
 0x31b   :  { %v1012_v39 = vmul.f32 0.1, %v489_v38  ;;  %v1014_v59 = vsub.f32 %v516_v56, %v514_v22  ;;  %v1019_v49 = vsub.f32 %v514_v22, %v512_v58 }
 0x31d   :  { %v1821_v41 = vadd.f32 %v1012_v39, %v516_v56 }
 0x31e   :  { %v469_v62 = vpop.xlane.xlu0 %468  ;;  %v510_v53 = vpop.xlane.xlu1 %509 }
 0x31f   :  { %v1015_v19 = vmul.f32 0.99, %v1821_v41  ;;  %v1831_v17 = vmul.f32 0.5, %v469_v62  ;;  %v1024_v54 = vsub.f32 %v512_v58, %v510_v53 }
 0x321   :  { %v1016_v44 = vadd.f32 %v1015_v19, %v1014_v59  ;;  %v487_v43 = vsub.f32 -0.4515827, %v1831_v17 }
 0x322   :  { %v467_v46 = vpop.xlane.xlu0 %466  ;;  %v508_v0 = vpop.xlane.xlu1 %507 }
 0x323   :  { %v1829_v48 = vadd.f32 %v1017_v18, %v1016_v44  ;;  %v1022_v51 = vmul.f32 0.1, %v487_v43  ;;  %v478_v52 = vmul.f32 0.5, %v467_v46  ;;  %v1029_v1 = vsub.f32 %v510_v53, %v508_v0 }
 0x325   :  { %v1020_v16 = vmul.f32 0.99, %v1829_v48  ;;  %v486_v55 = vsub.f32 -0.4515827, %v478_v52 }
 0x326   :  { %v465_v60 = vpop.xlane.xlu0 %464  ;;  %v506_v8 = vpop.xlane.xlu1 %505 }
 0x327   :  { %v1021_v50 = vadd.f32 %v1020_v16, %v1019_v49  ;;  %v1027_v57 = vmul.f32 0.1, %v486_v55  ;;  %v477_v63 = vmul.f32 0.5, %v465_v60  ;;  %v1034_v11 = vsub.f32 %v508_v0, %v506_v8 }
 0x329   :  { %v1837_v47 = vadd.f32 %v1022_v51, %v1021_v50  ;;  %v485_v3 = vsub.f32 -0.4515827, %v477_v63 }
 0x32a   :  { %v463_v32 = vpop.xlane.xlu0 %462 }
 0x32b   :  { %v1025_v4 = vmul.f32 0.99, %v1837_v47  ;;  %v1032_v7 = vmul.f32 0.1, %v485_v3  ;;  %v476_v9 = vmul.f32 0.5, %v463_v32 }
 0x32d   :  { %v1026_v45 = vadd.f32 %v1025_v4, %v1024_v54 }
 0x32f   :  { %v1028_v61 = vadd.f32 %v1027_v57, %v1026_v45 }
 0x331   :  { %v1030_v2 = vmul.f32 0.99, %v1028_v61 }
 0x333   :  { %v1031_v6 = vadd.f32 %v1030_v2, %v1029_v1 }
 0x335   :  { %v1033_v5 = vadd.f32 %v1032_v7, %v1031_v6 }
 0x337   :  { %v1035_v12 = vmul.f32 0.99, %v1033_v5 }
 0x36e   :  { %v1427_v13 = vpop.f32.mrf.mxu1 }
 0x36f   :  { %v974_v24 = vadd.f32 %v1427_v13, %v1208_v14  ;;  %v459_v13 = vpop.xlane.xlu0 %458 }
 0x370   :  { %v965_v20 = vpop.f32.mrf.mxu1 }
 0x371   :  { %v966_v10 = vadd.f32 %v1208_v14, %v965_v20  ;;  %v461_v20 = vpop.xlane.xlu1 %460 }
 0x372   :  { %v1428_v15 = vpop.f32.mrf.mxu1 }
 0x373   :  { %996 = vadd.xlane.f32.xlu0 %v966_v10  ;;  %v977_v28 = vadd.f32 %v1428_v15, %v1208_v14  ;;  %v1036_v10 = vadd.f32 %v1035_v12, %v1034_v11  ;;  %v474_v15 = vmul.f32 0.5, %v459_v13 }
 0x374   :  { %v968_v21 = vpop.f32.mrf.mxu1 }
 0x375   :  { %v969_v25 = vadd.f32 %v1208_v14, %v968_v21  ;;  %v475_v21 = vmul.f32 0.5, %v461_v20 }
 0x376   :  { %v1431_v26 = vpop.f32.mrf.mxu1 }
 0x377   :  { %998 = vadd.xlane.f32.xlu1 %v969_v25  ;;  %1000 = vadd.xlane.f32.xlu0 %v974_v24  ;;  %v990_v33 = vadd.f32 %v1431_v26, %v1208_v14  ;;  %v482_v26 = vsub.f32 -0.4515827, %v474_v15 }
 0x378   :  { %v981_v27 = vpop.f32.mrf.mxu1 }
 0x379   :  { %v982_v29 = vadd.f32 %v1208_v14, %v981_v27  ;;  %v483_v27 = vsub.f32 -0.4515827, %v475_v21 }
 0x37a   :  { %v1432_v30 = vpop.f32.mrf.mxu1 }
 0x37b   :  { %1002 = vadd.xlane.f32.xlu1 %v977_v28  ;;  %1004 = vadd.xlane.f32.xlu0 %v982_v29  ;;  %v993_v35 = vadd.f32 %v1432_v30, %v1208_v14  ;;  %v504_v28 = vpop.xlane.xlu0 %503  ;;  %v1050_v29 = vadd.f32 %v483_v27, %v482_v26  ;;  %v1042_v56 = vmul.f32 0.1, %v483_v27 }
 0x37c   :  { %v984_v31 = vpop.f32.mrf.mxu1 }
 0x37d   :  { %v985_v34 = vadd.f32 %v1208_v14, %v984_v31  ;;  %v484_v14 = vsub.f32 -0.4515827, %v476_v9  ;;  %v1039_v31 = vsub.f32 %v506_v8, %v504_v28 }
 0x37f   :  { %1006 = vadd.xlane.f32.xlu1 %v985_v34  ;;  %1008 = vadd.xlane.f32.xlu0 %v990_v33  ;;  %v1037_v24 = vmul.f32 0.1, %v484_v14  ;;  %v502_v33 = vpop.xlane.xlu1 %501  ;;  %v1045_v34 = vmul.f32 0.1, %v482_v26 }
 0x380   :  { %v1044_v39 = vsub.f32 %v504_v28, %v502_v33 }
 0x381   :  { %v1038_v25 = vadd.f32 %v1037_v24, %v1036_v10 }
 0x382   :  { %v1046_v59 = vadd.f32 %v1045_v34, %v1044_v39 }
 0x383   :  { %1010 = vadd.xlane.f32.xlu1 %v993_v35  ;;  %v1040_v30 = vmul.f32 0.99, %v1038_v25  ;;  %v1053_v35 = vadd.f32 %v1050_v29, %v484_v14 }
 0x385   :  { %v1041_v36 = vadd.f32 %v1040_v30, %v1039_v31  ;;  %v1056_v22 = vadd.f32 %v1053_v35, %v485_v3 }
 0x387   :  { %v1043_v19 = vadd.f32 %v1042_v56, %v1041_v36  ;;  %v1059_v49 = vadd.f32 %v1056_v22, %v486_v55 }
 0x389   :  { %v1062_v45 = vadd.f32 %v1059_v49, %v487_v43 }
 0x38b   :  { %v1065_v55 = vadd.f32 %v1062_v45, %v488_v23 }
 0x38d   :  { %v1068_v17 = vadd.f32 %v1065_v55, %v489_v38 }
 0x3fc   :  { %v997_v40 = vpop.xlane.xlu0 %996 }
 0x3fd   :  { %v1047_v62 = vsub.f32 %v1046_v59, %v997_v40 }
 0x400   :  { %v999_v44 = vpop.xlane.xlu1 %998  ;;  %v1001_v18 = vpop.xlane.xlu0 %1000 }
 0x401   :  { %v1048_v58 = vsub.f32 %v1043_v19, %v999_v44  ;;  %v1051_v50 = vsub.f32 %v1038_v25, %v1001_v18 }
 0x403   :  { %v1049_v16 = vadd.f32 %v1048_v58, %v1047_v62 }
 0x404   :  { %v1003_v51 = vpop.xlane.xlu1 %1002  ;;  %v1005_v46 = vpop.xlane.xlu0 %1004 }
 0x405   :  { %v1052_v52 = vadd.f32 %v1051_v50, %v1049_v16  ;;  %v1054_v53 = vsub.f32 %v1033_v5, %v1003_v51  ;;  %v1057_v4 = vsub.f32 %v1028_v61, %v1005_v46 }
 0x407   :  { %v1055_v54 = vadd.f32 %v1054_v53, %v1052_v52 }
 0x408   :  { %v1007_v57 = vpop.xlane.xlu1 %1006  ;;  %v1009_v60 = vpop.xlane.xlu0 %1008 }
 0x409   :  { %v1058_v63 = vadd.f32 %v1057_v4, %v1055_v54  ;;  %v1060_v0 = vsub.f32 %v1837_v47, %v1007_v57  ;;  %v1063_v2 = vsub.f32 %v1829_v48, %v1009_v60 }
 0x40b   :  { %v1061_v1 = vadd.f32 %v1060_v0, %v1058_v63 }
 0x40c   :  { %v1011_v3 = vpop.xlane.xlu1 %1010 }
 0x40d   :  { %v1064_v6 = vadd.f32 %v1063_v2, %v1061_v1  ;;  %v1066_v7 = vsub.f32 %v1821_v41, %v1011_v3 }
 0x40f   :  { %v1067_v32 = vadd.f32 %v1066_v7, %v1064_v6 }
 0x411   :  { %v1069_v43 = vmul.f32 %v1068_v17, %v1067_v32 }
 0x413   :  { %v1070_v61 = vrot.slane %v1069_v43, 4 }
 0x415   :  { %v1071_v5 = vadd.f32 %v1070_v61, %v1069_v43 }
 0x417   :  { %v1072_v8 = vrot.slane %v1071_v5, 2 }
 0x419   :  { %v1073_v9 = vadd.f32 %v1072_v8, %v1071_v5 }
 0x41b   :  { %v1074_v47 = vrot.slane %v1073_v9, 1 }
 0x41d   :  { %v1075_v11 = vadd.f32 %v1074_v47, %v1073_v9 }
 0x41f   :  { %v1076_v12 = vmul.f32 0.015625, %v1075_v11 }
 0x421   :  { %1078 = vst [vmem:[%s1855_s3] sm:$0xff] %v1076_v12 }

</bundles_post_ra>
